<compile_context>
chip_gen: v5e
topology: v5e:2x2
jax: 0.10.0
libtpu: 0.0.40
codegen_flags: <defaults>
</compile_context>

<pallas_src>
import math

import jax
import jax.numpy as jnp
from jax.experimental import pallas as pl
from jax.experimental.pallas import tpu as pltpu


def _copy_kernel(x_ref, o_ref):
    # Identical lane-dense tiles on both sides: pure streaming copy.
    o_ref[...] = x_ref[...]


# ~2 MiB blocks: 4 double-buffered buffers (in + out) stay < 16 MiB scoped
# VMEM (v5e default), and comfortably fit v7x's 64 MiB physical VMEM.
_TARGET_BLOCK_BYTES = 2 * 1024 * 1024


def _pick_lane_width(total):
    """Largest lane-dense width (multiple of 128, capped at 1024) dividing total."""
    for lanes in (1024, 512, 256, 128):
        if total % lanes == 0:
            return lanes
    return total  # tiny / awkward element counts: single full-extent row


def _pick_block_rows(rows, lanes, itemsize):
    """Rows per block: multiple of the sublane-packing factor, ~2 MiB total."""
    sub = max(8, 32 // max(1, itemsize))          # 8 (f32), 16 (bf16), 32 (int8)
    max_rows = max(sub, (_TARGET_BLOCK_BYTES // (lanes * itemsize)) // sub * sub)
    if rows <= max_rows:
        return rows                               # full extent: always legal
    tb = max_rows
    while tb >= sub:                              # prefer an exact divisor
        if rows % tb == 0:
            return tb
        tb -= sub
    return max_rows                               # ragged last block: stores masked


def pallas_reshape(x, size):
    """Equivalent of torch `x.view(-1, *size)`; the data copy runs in a Pallas
    kernel, all shape bookkeeping is free metadata in the wrapper."""
    size = tuple(int(s) for s in size)
    total = math.prod(x.shape)
    per_sample = math.prod(size)
    if per_sample <= 0 or total % per_sample != 0:
        raise ValueError(f"cannot infer -1 dimension: total={total}, size={size}")
    batch = total // per_sample

    itemsize = jnp.dtype(x.dtype).itemsize
    lanes = _pick_lane_width(total)
    rows = total // lanes
    block_rows = _pick_block_rows(rows, lanes, itemsize)
    grid = (pl.cdiv(rows, block_rows),)

    # Metadata-only flatten to the shared lane-dense 2D view.
    x2d = x.reshape(rows, lanes)

    out2d = pl.pallas_call(
        _copy_kernel,
        out_shape=jax.ShapeDtypeStruct((rows, lanes), x.dtype),
        grid=grid,
        in_specs=[pl.BlockSpec((block_rows, lanes), lambda i: (i, 0))],
        out_specs=pl.BlockSpec((block_rows, lanes), lambda i: (i, 0)),
        compiler_params=pltpu.CompilerParams(
            # Row axis is independent -> shards across both TensorCores on v7x
            # (measured no-op on single-TC v5e/v6e).
            dimension_semantics=("parallel",),
        ),
    )(x2d)

    # Metadata-only reshape to the user-facing (-1, *size) shape.
    return out2d.reshape((batch,) + size)


if __name__ == "__main__":
    key = jax.random.PRNGKey(0)
    # Module: Reshape(size=(8, 128)); input x: (2, 4, 16, 16) NCHW,
    # total elements = 2048 -> view(-1, 8, 128) == (2, 8, 128).
    x = jax.random.normal(key, (2, 4, 16, 16), dtype=jnp.float32)
    size = (8, 128)

    y = pallas_reshape(x, size)
    jax.block_until_ready(y)

    y_ref = jnp.reshape(x, (-1,) + size)
    assert y.shape == y_ref.shape, (y.shape, y_ref.shape)
    assert y.dtype == y_ref.dtype
    assert bool(jnp.all(y == y_ref))

    # Secondary sanity check: a `size` whose last dim is < 128 (correctness
    # unaffected; only the wrapper-level metadata reshape differs).
    size2 = (4, 16, 16)
    y2 = pallas_reshape(x, size2)
    jax.block_until_ready(y2)
    y2_ref = jnp.reshape(x, (-1,) + size2)
    assert y2.shape == y2_ref.shape and bool(jnp.all(y2 == y2_ref))

    print("KERNEL_OK")
</pallas_src>

<mosaic_0001>
module attributes {stable_mosaic.version = 11 : i64} {
  func.func @_copy_kernel(%arg0: i32, %arg1: memref<2x1024xf32, #tpu.memory_space<vmem>>, %arg2: memref<2x1024xf32, #tpu.memory_space<vmem>>) attributes {dimension_semantics = [#tpu.dimension_semantics<parallel>], iteration_bounds = array<i64: 1>, scalar_prefetch = 0 : i64, scratch_operands = 0 : i64, tpu.core_type = #tpu.core_type<tc>, window_params = [{transform_indices = @transform_0, window_bounds = array<i64: 2, 1024>}, {transform_indices = @transform_1, window_bounds = array<i64: 2, 1024>}]} {
    %c0 = arith.constant 0 : index
    %c0_0 = arith.constant 0 : index
    %0 = vector.load %arg1[%c0, %c0_0] : memref<2x1024xf32, #tpu.memory_space<vmem>>, vector<2x1024xf32>
    %c0_1 = arith.constant 0 : index
    %c0_2 = arith.constant 0 : index
    %1 = vector.load %arg2[%c0_1, %c0_2] : memref<2x1024xf32, #tpu.memory_space<vmem>>, vector<2x1024xf32>
    tpu.vector_store %arg2[%c0_1, %c0_2], %0 {strides = array<i32>} : memref<2x1024xf32, #tpu.memory_space<vmem>>, vector<2x1024xf32>,
    return
  }
  func.func @transform_0(%arg0: i32) -> (i32, i32) {
    %c0_i32 = arith.constant 0 : i32
    %c0_i32_0 = arith.constant 0 : i32
    return %arg0, %c0_i32 : i32, i32
  }
  func.func @transform_1(%arg0: i32) -> (i32, i32) {
    %c0_i32 = arith.constant 0 : i32
    %c0_i32_0 = arith.constant 0 : i32
    return %arg0, %c0_i32 : i32, i32
  }
}

</mosaic_0001>

<bundles_post_ra>
// kernel: tpu_custom_call.1
= control target key start
LH: loop header
LB: loop body
LE: loop exit
PB: predicated region body
PF: predicated region fallthrough
CT: control target
= control target key end

     0   :  { %6 = vsyncpa [#allocation3], 0  ;;  %s116_s0 = inlined_call_operand.hbm [shape: f32[2,1024], index: 0, kind: input, shape index: {}]   ;;  %s117_s1 = inlined_call_operand.hbm [shape: f32[2,1024], index: 1, kind: output, shape index: {}]  }
   0x1   :  { %7 = vsyncpa [#allocation4], 0  ;;  %s13_s8 = sshll.u32 %s116_s0, 4  ;;  %s98_s9 = smov [#allocation2]   ;;  %s14_s8 = int_to_ptr.hbm [resolvable:$true] %s13_s8 }
   0x2   :  { %s15_s10 = sshll.u32 %s98_s9, 4  ;;  %s16_s10 = int_to_ptr.vmem [resolvable:$true] %s15_s10 }
   0x3   :  { %18 = dma.hbm_to_vmem [thread:$0]  %s14_s8, 256, %s16_s10, [#allocation3]  }
   0x4   :  { %94 = dma.done.wait [#allocation3], 256  }
   0x5   :  { %95 = vsyncadd [#allocation3], 4294967040  ;;  %s99_s11 = smov [#allocation5]   ;;  %s34_s15 = sshll.u32 %s117_s1, 4  ;;  %v23_v0 = vld [vmem:[#allocation2] sm:$0xff]  ;;  %v24_v1 = vld [vmem:[#allocation2 + $0x8] sm:$0xff]  ;;  %s35_s15 = int_to_ptr.hbm [resolvable:$true] %s34_s15 }
   0x6   :  { %s32_s12 = sshll.u32 %s99_s11, 4  ;;  %25 = vst [vmem:[#allocation5] sm:$0xff] %v23_v0  ;;  %s33_s12 = int_to_ptr.vmem [resolvable:$true] %s32_s12 }
   0x7   :  { %26 = vst [vmem:[#allocation5 + $0x8] sm:$0xff] %v24_v1 }
   0x8   :  { %37 = dma.vmem_to_hbm [thread:$0]  %s33_s12, 256, %s35_s15, [#allocation4]  }
   0x9   :  { %96 = dma.done.wait [#allocation4], 256  }
   0xa   :  { %97 = vsyncadd [#allocation4], 4294967040 }
   0xb   :  { %42 = vsyncpa [#allocation3], 1 }
   0xc   :  { %43 = vsyncpa [#allocation4], 1 }

</bundles_post_ra>
